<compile_context>
chip_gen: v7x
topology: tpu7x:2x2x1
jax: 0.10.0
libtpu: 0.0.40
codegen_flags: <defaults>
</compile_context>

<pallas_src>
import math
import jax
import jax.numpy as jnp
from jax.experimental import pallas as pl
from jax.experimental.pallas import tpu as pltpu

_INV_SQRT2 = 1.0 / math.sqrt(2.0)


def _round_up(x, m):
    return ((x + m - 1) // m) * m


def _erf_poly(z):
    """erf via Abramowitz & Stegun 7.1.26 (max abs error ~1.5e-7).

    Uses only mul/add/div/exp/select so it lowers in Mosaic regardless of whether
    lax.erf_p has a Pallas-TPU lowering rule.
    """
    a1 = 0.254829592
    a2 = -0.284496736
    a3 = 1.421413741
    a4 = -1.453152027
    a5 = 1.061405429
    p = 0.3275911
    az = jnp.abs(z)
    t = 1.0 / (1.0 + p * az)
    poly = t * (a1 + t * (a2 + t * (a3 + t * (a4 + t * a5))))
    e = 1.0 - poly * jnp.exp(-az * az)
    return jnp.where(z < 0.0, -e, e)


def _gelu_exact(h):
    # torch.nn.GELU() default (approximate='none'): 0.5 * h * (1 + erf(h / sqrt(2)))
    return 0.5 * h * (1.0 + _erf_poly(h * _INV_SQRT2))


def _ff_kernel(x_ref, w1_ref, b1_ref, w2_ref, b2_ref, o_ref, acc_ref):
    # Grid: (row_tiles, inner_tiles). Axis 1 is the reduction over the hidden dim.
    n = pl.program_id(1)

    @pl.when(n == 0)
    def _():
        acc_ref[...] = jnp.zeros_like(acc_ref)

    # First matmul on this inner tile: (tm, dim) @ (dim, tn) -> f32.
    h = jnp.dot(x_ref[...], w1_ref[...], preferred_element_type=jnp.float32)
    h = h + b1_ref[...]
    # Exact (erf-based) GELU; elementwise, so applying it per inner tile before the
    # accumulation over the hidden dim is exact. Dropout(p=0.0) is the identity.
    h = _gelu_exact(h)
    # Second matmul tile, cast operand back to MXU dtype, accumulate in f32.
    acc_ref[...] += jnp.dot(h.astype(w2_ref.dtype), w2_ref[...],
                            preferred_element_type=jnp.float32)

    @pl.when(n == pl.num_programs(1) - 1)
    def _():
        o_ref[...] = (acc_ref[...] + b2_ref[...]).astype(o_ref.dtype)


def feed_forward(x, w1, b1, w2, b2, *, tm=256, tn=512, matmul_dtype=None):
    """x: (B, S, dim); w1: (dim, inner); b1: (inner,); w2: (inner, dim_out); b2: (dim_out,).

    Weights are stored (in, out) (transposed relative to torch) so the kernel does
    row-major matmuls. `matmul_dtype` (e.g. jnp.bfloat16 on v6e/v7x) controls the MXU
    operand dtype; accumulation is always f32.
    """
    B, S, dim = x.shape
    inner = w1.shape[1]
    dim_out = w2.shape[1]
    M = B * S

    mm_dtype = x.dtype if matmul_dtype is None else matmul_dtype

    # --- tile selection (clamped to the padded problem, sublane/lane aligned) ---
    tm = min(tm, _round_up(M, 8))
    tm = _round_up(tm, 8)
    tn = min(tn, _round_up(inner, 128))
    tn = _round_up(tn, 128)

    M_p = _round_up(M, tm)               # ragged rows -> zero pad
    inner_p = _round_up(inner, tn)       # hidden dim padded to a multiple of tn (zeros)
    dim_out_p = _round_up(dim_out, 128)  # lane-dense output stores

    # --- pack / pad operands ---
    x2 = x.reshape(M, dim).astype(mm_dtype)
    if M_p != M:
        x2 = jnp.pad(x2, ((0, M_p - M), (0, 0)))

    w1p = w1.astype(mm_dtype)
    b1p = b1.astype(jnp.float32)
    w2p = w2.astype(mm_dtype)
    b2p = b2.astype(jnp.float32)
    if inner_p != inner:
        # Zero-padded hidden columns: h = 0, gelu(0) = 0 -> contribute nothing. Safe.
        w1p = jnp.pad(w1p, ((0, 0), (0, inner_p - inner)))
        b1p = jnp.pad(b1p, ((0, inner_p - inner),))
        w2p = jnp.pad(w2p, ((0, inner_p - inner), (0, 0)))
    if dim_out_p != dim_out:
        w2p = jnp.pad(w2p, ((0, 0), (0, dim_out_p - dim_out)))
        b2p = jnp.pad(b2p, ((0, dim_out_p - dim_out),))

    b1_2 = b1p.reshape(1, inner_p)
    b2_2 = b2p.reshape(1, dim_out_p)

    grid = (M_p // tm, inner_p // tn)

    mm_bytes = jnp.dtype(mm_dtype).itemsize
    out_bytes = jnp.dtype(x.dtype).itemsize
    cost = pl.CostEstimate(
        flops=2 * M_p * dim * inner_p + 2 * M_p * inner_p * dim_out_p,
        transcendentals=M_p * inner_p,
        bytes_accessed=(x2.size * mm_bytes + w1p.size * mm_bytes + w2p.size * mm_bytes
                        + b1_2.size * 4 + b2_2.size * 4 + M_p * dim_out_p * out_bytes),
    )

    out2 = pl.pallas_call(
        _ff_kernel,
        out_shape=jax.ShapeDtypeStruct((M_p, dim_out_p), x.dtype),
        grid_spec=pltpu.PrefetchScalarGridSpec(
            num_scalar_prefetch=0,
            grid=grid,
            in_specs=[
                pl.BlockSpec((tm, dim), lambda i, n: (i, 0)),         # x rows (resident over n)
                pl.BlockSpec((dim, tn), lambda i, n: (0, n)),         # w1 inner tile (streamed)
                pl.BlockSpec((1, tn), lambda i, n: (0, n)),           # b1 inner tile
                pl.BlockSpec((tn, dim_out_p), lambda i, n: (n, 0)),   # w2 inner tile (streamed)
                pl.BlockSpec((1, dim_out_p), lambda i, n: (0, 0)),    # b2 (constant)
            ],
            out_specs=pl.BlockSpec((tm, dim_out_p), lambda i, n: (i, 0)),
            scratch_shapes=[pltpu.VMEM((tm, dim_out_p), jnp.float32)],
        ),
        compiler_params=pltpu.CompilerParams(
            dimension_semantics=("parallel", "arbitrary"),
            vmem_limit_bytes=64 * 1024 * 1024,
        ),
        cost_estimate=cost,
    )(x2, w1p, b1_2, w2p, b2_2)

    return out2[:M, :dim_out].reshape(B, S, dim_out)


def init_params(key, dim, dim_out=None, mult=4, dtype=jnp.float32):
    """Deterministic init mirroring torch.nn.Linear default U(-1/sqrt(fan_in), 1/sqrt(fan_in))."""
    inner_dim = int(dim * mult)
    dim_out = dim_out if dim_out is not None else dim
    k1, k2, k3, k4 = jax.random.split(key, 4)
    bound1 = 1.0 / math.sqrt(dim)
    bound2 = 1.0 / math.sqrt(inner_dim)
    w1 = jax.random.uniform(k1, (dim, inner_dim), dtype, -bound1, bound1)
    b1 = jax.random.uniform(k2, (inner_dim,), dtype, -bound1, bound1)
    w2 = jax.random.uniform(k3, (inner_dim, dim_out), dtype, -bound2, bound2)
    b2 = jax.random.uniform(k4, (dim_out,), dtype, -bound2, bound2)
    return w1, b1, w2, b2


def _reference(x, w1, b1, w2, b2):
    # Plain-JAX reference with the true (exact) erf.
    h = x @ w1 + b1
    h = 0.5 * h * (1.0 + jax.lax.erf(h * _INV_SQRT2))
    return h @ w2 + b2


if __name__ == "__main__":
    key = jax.random.PRNGKey(0)

    # Case 1: canonical small shape (B, S, dim) = (2, 8, 32), mult=4 -> inner=128, dim_out=32.
    B, S, dim, mult = 2, 8, 32, 4
    kx, kp, kx2 = jax.random.split(key, 3)
    x = jax.random.normal(kx, (B, S, dim), jnp.float32)
    w1, b1, w2, b2 = init_params(kp, dim, mult=mult)

    out = feed_forward(x, w1, b1, w2, b2)
    jax.block_until_ready(out)
    out_ref = _reference(x, w1, b1, w2, b2)
    assert out.shape == (B, S, dim)
    # Tolerance accounts for TPU default-precision (bf16-pass) matmul rounding differences
    # between the Mosaic kernel and the XLA reference, plus the |err|<=1.5e-7 erf polynomial.
    assert jnp.allclose(out, out_ref, atol=5e-3, rtol=5e-3), \
        float(jnp.max(jnp.abs(out - out_ref)))

    # Case 2: ragged row count (exercises the M-padding path), same params.
    x_rag = jax.random.normal(kx2, (3, 5, dim), jnp.float32)   # M = 15
    out_rag = feed_forward(x_rag, w1, b1, w2, b2)
    jax.block_until_ready(out_rag)
    out_rag_ref = _reference(x_rag, w1, b1, w2, b2)
    assert out_rag.shape == (3, 5, dim)
    assert jnp.allclose(out_rag, out_rag_ref, atol=5e-3, rtol=5e-3), \
        float(jnp.max(jnp.abs(out_rag - out_rag_ref)))

    print("KERNEL_OK")
</pallas_src>

<mosaic_0001>
module attributes {stable_mosaic.version = 11 : i64} {
  func.func @_ff_kernel(%arg0: i32, %arg1: i32, %arg2: memref<16x32xf32, #tpu.memory_space<vmem>>, %arg3: memref<32x128xf32, #tpu.memory_space<vmem>>, %arg4: memref<1x128xf32, #tpu.memory_space<vmem>>, %arg5: memref<128x128xf32, #tpu.memory_space<vmem>>, %arg6: memref<1x128xf32, #tpu.memory_space<vmem>>, %arg7: memref<16x128xf32, #tpu.memory_space<vmem>>, %arg8: memref<16x128xf32, #tpu.memory_space<vmem>>) attributes {dimension_semantics = [#tpu.dimension_semantics<parallel>, #tpu.dimension_semantics<arbitrary>], iteration_bounds = array<i64: 1, 1>, scalar_prefetch = 0 : i64, scratch_operands = 1 : i64, tpu.core_type = #tpu.core_type<tc>, window_params = [{transform_indices = @transform_0, window_bounds = array<i64: 16, 32>}, {transform_indices = @transform_1, window_bounds = array<i64: 32, 128>}, {transform_indices = @transform_2, window_bounds = array<i64: 1, 128>}, {transform_indices = @transform_3, window_bounds = array<i64: 128, 128>}, {pipeline_mode = #tpu.pipeline_mode<synchronous>, transform_indices = @transform_4, window_bounds = array<i64: 1, 128>}, {transform_indices = @transform_5, window_bounds = array<i64: 16, 128>}]} {
    %c0_i32 = arith.constant 0 : i32
    %0 = arith.cmpi eq, %arg1, %c0_i32 : i32
    %1 = arith.extui %0 : i1 to i32
    %c0_i32_0 = arith.constant 0 : i32
    %2 = arith.cmpi ne, %1, %c0_i32_0 : i32
    scf.if %2 {
      %cst_30 = arith.constant 0.000000e+00 : f32
      %57 = vector.broadcast %cst_30 : f32 to vector<16x128xf32>
      %c0_31 = arith.constant 0 : index
      %c0_32 = arith.constant 0 : index
      %58 = vector.load %arg8[%c0_31, %c0_32] : memref<16x128xf32, #tpu.memory_space<vmem>>, vector<16x128xf32>
      tpu.vector_store %arg8[%c0_31, %c0_32], %57 {strides = array<i32>} : memref<16x128xf32, #tpu.memory_space<vmem>>, vector<16x128xf32>,
    } else {
    }
    %c0 = arith.constant 0 : index
    %c0_1 = arith.constant 0 : index
    %3 = vector.load %arg2[%c0, %c0_1] : memref<16x32xf32, #tpu.memory_space<vmem>>, vector<16x32xf32>
    %c0_2 = arith.constant 0 : index
    %c0_3 = arith.constant 0 : index
    %4 = vector.load %arg3[%c0_2, %c0_3] : memref<32x128xf32, #tpu.memory_space<vmem>>, vector<32x128xf32>
    %cst = arith.constant dense<0.000000e+00> : vector<16x128xf32>
    %5 = tpu.matmul %3, %4, %cst {dimension_numbers = #tpu.dot_dimension_numbers<[1], [0], [0], [1], [0, 0, 1, 1], [], []>} : vector<16x32xf32>, vector<32x128xf32>, vector<16x128xf32> -> vector<16x128xf32>
    %c0_4 = arith.constant 0 : index
    %c0_5 = arith.constant 0 : index
    %6 = vector.load %arg4[%c0_4, %c0_5] : memref<1x128xf32, #tpu.memory_space<vmem>>, vector<1x128xf32>
    %7 = vector.broadcast %6 : vector<1x128xf32> to vector<16x128xf32>
    %8 = arith.addf %5, %7 : vector<16x128xf32>
    %cst_6 = arith.constant 5.000000e-01 : f32
    %9 = vector.broadcast %cst_6 : f32 to vector<16x128xf32>
    %10 = arith.mulf %9, %8 : vector<16x128xf32>
    %cst_7 = arith.constant 0.707106769 : f32
    %11 = vector.broadcast %cst_7 : f32 to vector<16x128xf32>
    %12 = arith.mulf %8, %11 : vector<16x128xf32>
    %13 = math.absf %12 : vector<16x128xf32>
    %cst_8 = arith.constant 0.327591091 : f32
    %14 = vector.broadcast %cst_8 : f32 to vector<16x128xf32>
    %15 = arith.mulf %14, %13 : vector<16x128xf32>
    %cst_9 = arith.constant 1.000000e+00 : f32
    %16 = vector.broadcast %cst_9 : f32 to vector<16x128xf32>
    %17 = arith.addf %16, %15 : vector<16x128xf32>
    %cst_10 = arith.constant 1.000000e+00 : f32
    %18 = vector.broadcast %cst_10 : f32 to vector<16x128xf32>
    %19 = arith.divf %18, %17 : vector<16x128xf32>
    %cst_11 = arith.constant 1.06140542 : f32
    %20 = vector.broadcast %cst_11 : f32 to vector<16x128xf32>
    %21 = arith.mulf %19, %20 : vector<16x128xf32>
    %cst_12 = arith.constant -1.45315206 : f32
    %22 = vector.broadcast %cst_12 : f32 to vector<16x128xf32>
    %23 = arith.addf %22, %21 : vector<16x128xf32>
    %24 = arith.mulf %19, %23 : vector<16x128xf32>
    %cst_13 = arith.constant 1.42141378 : f32
    %25 = vector.broadcast %cst_13 : f32 to vector<16x128xf32>
    %26 = arith.addf %25, %24 : vector<16x128xf32>
    %27 = arith.mulf %19, %26 : vector<16x128xf32>
    %cst_14 = arith.constant -0.284496725 : f32
    %28 = vector.broadcast %cst_14 : f32 to vector<16x128xf32>
    %29 = arith.addf %28, %27 : vector<16x128xf32>
    %30 = arith.mulf %19, %29 : vector<16x128xf32>
    %cst_15 = arith.constant 0.254829586 : f32
    %31 = vector.broadcast %cst_15 : f32 to vector<16x128xf32>
    %32 = arith.addf %31, %30 : vector<16x128xf32>
    %33 = arith.mulf %19, %32 : vector<16x128xf32>
    %cst_16 = arith.constant 0.000000e+00 : f32
    %34 = vector.broadcast %cst_16 : f32 to vector<16x128xf32>
    %35 = arith.subf %34, %13 : vector<16x128xf32>
    %36 = arith.mulf %35, %13 : vector<16x128xf32>
    %37 = math.exp %36 : vector<16x128xf32>
    %38 = arith.mulf %33, %37 : vector<16x128xf32>
    %cst_17 = arith.constant 1.000000e+00 : f32
    %39 = vector.broadcast %cst_17 : f32 to vector<16x128xf32>
    %40 = arith.subf %39, %38 : vector<16x128xf32>
    %cst_18 = arith.constant 0.000000e+00 : f32
    %41 = vector.broadcast %cst_18 : f32 to vector<16x128xf32>
    %42 = arith.cmpf olt, %12, %41 : vector<16x128xf32>
    %cst_19 = arith.constant 0.000000e+00 : f32
    %43 = vector.broadcast %cst_19 : f32 to vector<16x128xf32>
    %44 = arith.subf %43, %40 : vector<16x128xf32>
    %45 = arith.select %42, %44, %40 : vector<16x128xi1>, vector<16x128xf32>
    %cst_20 = arith.constant 1.000000e+00 : f32
    %46 = vector.broadcast %cst_20 : f32 to vector<16x128xf32>
    %47 = arith.addf %46, %45 : vector<16x128xf32>
    %48 = arith.mulf %10, %47 : vector<16x128xf32>
    %c0_21 = arith.constant 0 : index
    %c0_22 = arith.constant 0 : index
    %49 = vector.load %arg8[%c0_21, %c0_22] : memref<16x128xf32, #tpu.memory_space<vmem>>, vector<16x128xf32>
    %c0_23 = arith.constant 0 : index
    %c0_24 = arith.constant 0 : index
    %50 = vector.load %arg5[%c0_23, %c0_24] : memref<128x128xf32, #tpu.memory_space<vmem>>, vector<128x128xf32>
    %cst_25 = arith.constant dense<0.000000e+00> : vector<16x128xf32>
    %51 = tpu.matmul %48, %50, %cst_25 {dimension_numbers = #tpu.dot_dimension_numbers<[1], [0], [0], [1], [0, 0, 1, 1], [], []>} : vector<16x128xf32>, vector<128x128xf32>, vector<16x128xf32> -> vector<16x128xf32>
    %52 = arith.addf %49, %51 : vector<16x128xf32>
    %c0_26 = arith.constant 0 : index
    %c0_27 = arith.constant 0 : index
    %53 = vector.load %arg8[%c0_26, %c0_27] : memref<16x128xf32, #tpu.memory_space<vmem>>, vector<16x128xf32>
    tpu.vector_store %arg8[%c0_26, %c0_27], %52 {strides = array<i32>} : memref<16x128xf32, #tpu.memory_space<vmem>>, vector<16x128xf32>,
    %c0_i32_28 = arith.constant 0 : i32
    %54 = arith.cmpi eq, %arg1, %c0_i32_28 : i32
    %55 = arith.extui %54 : i1 to i32
    %c0_i32_29 = arith.constant 0 : i32
    %56 = arith.cmpi ne, %55, %c0_i32_29 : i32
    scf.if %56 {
      %c0_30 = arith.constant 0 : index
      %c0_31 = arith.constant 0 : index
      %57 = vector.load %arg8[%c0_30, %c0_31] : memref<16x128xf32, #tpu.memory_space<vmem>>, vector<16x128xf32>
      %c0_32 = arith.constant 0 : index
      %c0_33 = arith.constant 0 : index
      %58 = vector.load %arg6[%c0_32, %c0_33] : memref<1x128xf32, #tpu.memory_space<vmem>>, vector<1x128xf32>
      %59 = vector.broadcast %58 : vector<1x128xf32> to vector<16x128xf32>
      %60 = arith.addf %57, %59 : vector<16x128xf32>
      %c0_34 = arith.constant 0 : index
      %c0_35 = arith.constant 0 : index
      %61 = vector.load %arg7[%c0_34, %c0_35] : memref<16x128xf32, #tpu.memory_space<vmem>>, vector<16x128xf32>
      tpu.vector_store %arg7[%c0_34, %c0_35], %60 {strides = array<i32>} : memref<16x128xf32, #tpu.memory_space<vmem>>, vector<16x128xf32>,
    } else {
    }
    return
  }
  func.func @transform_0(%arg0: i32, %arg1: i32) -> (i32, i32) {
    %c0_i32 = arith.constant 0 : i32
    %c0_i32_0 = arith.constant 0 : i32
    return %arg0, %c0_i32 : i32, i32
  }
  func.func @transform_1(%arg0: i32, %arg1: i32) -> (i32, i32) {
    %c0_i32 = arith.constant 0 : i32
    %c0_i32_0 = arith.constant 0 : i32
    return %c0_i32, %arg1 : i32, i32
  }
  func.func @transform_2(%arg0: i32, %arg1: i32) -> (i32, i32) {
    %c0_i32 = arith.constant 0 : i32
    %c0_i32_0 = arith.constant 0 : i32
    return %c0_i32, %arg1 : i32, i32
  }
  func.func @transform_3(%arg0: i32, %arg1: i32) -> (i32, i32) {
    %c0_i32 = arith.constant 0 : i32
    %c0_i32_0 = arith.constant 0 : i32
    return %arg1, %c0_i32 : i32, i32
  }
  func.func @transform_4(%arg0: i32, %arg1: i32) -> (i32, i32) {
    %c0_i32 = arith.constant 0 : i32
    %c0_i32_0 = arith.constant 0 : i32
    %c0_i32_1 = arith.constant 0 : i32
    return %c0_i32, %c0_i32_0 : i32, i32
  }
  func.func @transform_5(%arg0: i32, %arg1: i32) -> (i32, i32) {
    %c0_i32 = arith.constant 0 : i32
    %c0_i32_0 = arith.constant 0 : i32
    return %arg0, %c0_i32 : i32, i32
  }
}

</mosaic_0001>

<bundles_post_ra>
// kernel: tpu_custom_call.1
= control target key start
LH: loop header
LB: loop body
LE: loop exit
PB: predicated region body
PF: predicated region fallthrough
CT: control target
= control target key end

     0   :  { %10 = vsyncpa [#allocation4], 0  ;;  %s771_s0 = inlined_call_operand.hbm [shape: f32[16,32], index: 0, kind: input, shape index: {}]   ;;  %s772_s1 = inlined_call_operand.hbm [shape: f32[32,128], index: 1, kind: input, shape index: {}]   ;;  %s773_s2 = inlined_call_operand.hbm [shape: f32[1,128], index: 2, kind: input, shape index: {}]   ;;  %s774_s3 = inlined_call_operand.hbm [shape: f32[128,128], index: 3, kind: input, shape index: {}]   ;;  %s775_s4 = inlined_call_operand.hbm [shape: f32[1,128], index: 4, kind: input, shape index: {}]   ;;  %s776_s5 = inlined_call_operand.hbm [shape: f32[16,128], index: 5, kind: output, shape index: {}]  }
   0x1   :  { %11 = vsyncpa [#allocation7], 0 }
   0x2   :  { %12 = vsyncpa [#allocation10], 0 }
   0x3   :  { %13 = vsyncpa [#allocation5], 0  ;;  %s642_s18 = smov [#allocation6]   ;;  %s643_s20 = smov [#allocation9]  }
   0x4   :  { %s31_s19 = sshll.u32 %s642_s18, 4  ;;  %s53_s21 = sshll.u32 %s643_s20, 4  ;;  %s32_s19 = int_to_ptr.vmem [resolvable:$true] %s31_s19  ;;  %s680_s21 = int_to_ptr.vmem [resolvable:$true] %s53_s21 }
   0x5   :  { %s502_s24 = scalar_lea.hbm %s772_s1, 512 }
   0x6   :  { %p503_p0 = scmp.ne.s32.totalorder %s772_s1, %s502_s24  ;;  %p506_p1 = scmp.lt.u32.totalorder %s502_s24, %s772_s1 }
   0x8   :  { %p508_p2 = pnand %p506_p1, %p503_p0 }
   0xa   :  { %511 = shalt.err (!%p508_p2)
}
   0xb   :  { %s512_s29 = scalar_lea.vmem %s32_s19, 512  ;;  %p517_p4 = scmp.lt.s32.totalorder %s32_s19, %s32_s19 }
   0xc   :  { %p513_p3 = scmp.ne.s32.totalorder %s32_s19, %s512_s29  ;;  %p518_p5 = scmp.lt.s32.totalorder %s512_s29, %s512_s29 }
   0xe   :  { %p519_p6 = por %p518_p5, %p517_p4 }
  0x10   :  { %p520_p7 = pnand %p519_p6, %p513_p3 }
  0x12   :  { %523 = shalt.err (!%p520_p7)
}
  0x13   :  { %s644_s30 = smov 128   ;;  %s645_s6 = smov 8  }
  0x14   :  { %37 = dma.hbm_to_vmem [thread:$0]  %s772_s1, 512, %s32_s19, [#allocation7], %s644_s30, %s644_s30, %s645_s6  }
  0x15   :  { %s524_s11 = scalar_lea.hbm %s774_s3, 2048 }
  0x16   :  { %p525_p8 = scmp.ne.s32.totalorder %s774_s3, %s524_s11  ;;  %p528_p9 = scmp.lt.u32.totalorder %s524_s11, %s774_s3 }
  0x18   :  { %p530_p10 = pnand %p528_p9, %p525_p8 }
  0x1a   :  { %533 = shalt.err (!%p530_p10)
}
  0x1b   :  { %s534_s16 = scalar_lea.vmem %s680_s21, 2048  ;;  %p539_p12 = scmp.lt.s32.totalorder %s680_s21, %s680_s21 }
  0x1c   :  { %p535_p11 = scmp.ne.s32.totalorder %s680_s21, %s534_s16  ;;  %p540_p13 = scmp.lt.s32.totalorder %s534_s16, %s534_s16 }
  0x1e   :  { %p541_p0 = por %p540_p13, %p539_p12 }
  0x20   :  { %p542_p1 = pnand %p541_p0, %p535_p11 }
  0x22   :  { %545 = shalt.err (!%p542_p1)
}
  0x23   :  { %59 = dma.hbm_to_vmem [thread:$0]  %s774_s3, 2048, %s680_s21, [#allocation10], %s644_s30, %s644_s30, %s645_s6  }
  0x24   :  { %s646_s18 = smov [#allocation3]   ;;  %s647_s20 = smov [#allocation8]  }
  0x25   :  { %s19_s19 = sshll.u32 %s646_s18, 4  ;;  %s44_s22 = sshll.u32 %s647_s20, 4  ;;  %s20_s19 = int_to_ptr.vmem [resolvable:$true] %s19_s19  ;;  %s45_s22 = int_to_ptr.vmem [resolvable:$true] %s44_s22 }
  0x26   :  { %s546_s25 = scalar_lea.hbm %s771_s0, 256 }
  0x27   :  { %p547_p2 = scmp.ne.s32.totalorder %s771_s0, %s546_s25  ;;  %p550_p3 = scmp.lt.u32.totalorder %s546_s25, %s771_s0 }
  0x29   :  { %p552_p4 = pnand %p550_p3, %p547_p2 }
  0x2b   :  { %555 = shalt.err (!%p552_p4)
}
  0x2c   :  { %s556_s3 = scalar_lea.vmem %s20_s19, 256  ;;  %p561_p6 = scmp.lt.s32.totalorder %s20_s19, %s20_s19 }
  0x2d   :  { %p557_p5 = scmp.ne.s32.totalorder %s20_s19, %s556_s3  ;;  %p562_p7 = scmp.lt.s32.totalorder %s556_s3, %s556_s3 }
  0x2f   :  { %p563_p8 = por %p562_p7, %p561_p6 }
  0x31   :  { %p564_p9 = pnand %p563_p8, %p557_p5 }
  0x33   :  { %567 = shalt.err (!%p564_p9)
}
  0x34   :  { %25 = dma.hbm_to_vmem [thread:$0]  %s771_s0, 256, %s20_s19, [#allocation4], %s644_s30, %s644_s30, %s645_s6  }
  0x35   :  { %s568_s10 = scalar_lea.hbm %s773_s2, 16 }
  0x36   :  { %p569_p10 = scmp.ne.s32.totalorder %s773_s2, %s568_s10  ;;  %p572_p11 = scmp.lt.u32.totalorder %s568_s10, %s773_s2 }
  0x38   :  { %p574_p12 = pnand %p572_p11, %p569_p10 }
  0x3a   :  { %577 = shalt.err (!%p574_p12)
}
  0x3b   :  { %s578_s15 = scalar_lea.vmem %s45_s22, 16  ;;  %s582_s16 = scalar_lea.vmem %s45_s22, 32 }
  0x3c   :  { %p579_p13 = scmp.ne.s32.totalorder %s45_s22, %s578_s15  ;;  %p583_p0 = scmp.lt.s32.totalorder %s45_s22, %s45_s22 }
  0x3d   :  { %p584_p1 = scmp.lt.s32.totalorder %s582_s16, %s578_s15 }
  0x3f   :  { %p585_p2 = por %p584_p1, %p583_p0 }
  0x41   :  { %p586_p3 = pnand %p585_p2, %p579_p13 }
  0x43   :  { %589 = shalt.err (!%p586_p3)
}
  0x44   :  { %47 = dma.hbm_to_vmem [thread:$0]  %s773_s2, 16, %s45_s22, [#allocation7]  }
  0x45   :  { %s648_s17 = smov [#allocation11]   ;;  %s590_s23 = scalar_lea.hbm %s775_s4, 16 }
  0x46   :  { %s66_s18 = sshll.u32 %s648_s17, 4  ;;  %p591_p4 = scmp.ne.s32.totalorder %s775_s4, %s590_s23  ;;  %s67_s18 = int_to_ptr.vmem [resolvable:$true] %s66_s18 }
  0x47   :  { %p594_p5 = scmp.lt.u32.totalorder %s590_s23, %s775_s4 }
  0x49   :  { %p596_p6 = pnand %p594_p5, %p591_p4 }
  0x4b   :  { %599 = shalt.err (!%p596_p6)
}
  0x4c   :  { %s600_s28 = scalar_lea.vmem %s67_s18, 16  ;;  %s604_s2 = scalar_lea.vmem %s67_s18, 32 }
  0x4d   :  { %p601_p7 = scmp.ne.s32.totalorder %s67_s18, %s600_s28  ;;  %p605_p8 = scmp.lt.s32.totalorder %s67_s18, %s67_s18 }
  0x4e   :  { %p606_p9 = scmp.lt.s32.totalorder %s604_s2, %s600_s28 }
  0x50   :  { %p607_p10 = por %p606_p9, %p605_p8 }
  0x52   :  { %p608_p11 = pnand %p607_p10, %p601_p7 }
  0x54   :  { %611 = shalt.err (!%p608_p11)
}
  0x55   :  { %69 = dma.hbm_to_vmem [thread:$0]  %s775_s4, 16, %s67_s18, [#allocation10]  }
  0x56   :  { %634 = dma.done.wait [#allocation4], 256  }
  0x57   :  { %635 = vsyncadd [#allocation4], 4294967040 }
  0x58   :  { %636 = dma.done.wait [#allocation7], 528  }
  0x59   :  { %637 = vsyncadd [#allocation7], 4294966768 }
  0x5a   :  { %638 = dma.done.wait [#allocation10], 2064  }
  0x5b   :  { %639 = vsyncadd [#allocation10], 4294965232  ;;  %vm104_vm0 = vcmask 261120   ;;  %v93_v0 = vld [vmem:[#allocation6] sm:$0xff]  ;;  %v94_v1 = vld [vmem:[#allocation6 + $0x8] sm:$0xff]  ;;  %s649_s4 = smov [#allocation12]  }
  0x5c   :  { %v95_v2 = vld [vmem:[#allocation6 + $0x10] sm:$0xff]  ;;  %v446_v3 = vpack.c.bf16 %v94_v1, %v93_v0  ;;  %v96_v4 = vld [vmem:[#allocation6 + $0x18] sm:$0xff]  ;;  %v242_v8 = vld [vmem:[#allocation9] sm:$0xff]  ;;  %s358_s3 = sshll.u32 %s649_s4, 4  ;;  %s359_s3 = int_to_ptr.vmem [resolvable:$true] %s358_s3 }
  0x5d   :  { %v91_v5 = vld [vmem:[#allocation3] sm:$0xff]  ;;  %v450_v6 = vpack.c.bf16 %v96_v4, %v95_v2  ;;  %v92_v7 = vld [vmem:[#allocation3 + $0x8] sm:$0xff]  ;;  %v246_v14 = vld [vmem:[#allocation9 + $0x20] sm:$0xff]  ;;  %s612_s21 = scalar_lea.vmem %s359_s3, 256  ;;  %p617_p13 = scmp.lt.s32.totalorder %s359_s3, %s359_s3 }
  0x5e   :  { %408 = vmatprep.mubr.msk.f32.mxu0 %vm104_vm0, %v91_v5  ;;  %447 = vmatprep.subr.bf16.mxu0 %v446_v3  ;;  %v243_v9 = vld [vmem:[#allocation9 + $0x8] sm:$0xff]  ;;  %v244_v10 = vld [vmem:[#allocation9 + $0x10] sm:$0xff]  ;;  %v245_v12 = vld [vmem:[#allocation9 + $0x18] sm:$0xff]  ;;  %p613_p12 = scmp.ne.s32.totalorder %s359_s3, %s612_s21  ;;  %p618_p0 = scmp.lt.s32.totalorder %s612_s21, %s612_s21 }
  0x5f   :  { %449 = vmatpush3.bf16.msra.mxu0 %v446_v3  ;;  %v454_v11 = vpack.c.bf16 %v243_v9, %v242_v8  ;;  %v458_v13 = vpack.c.bf16 %v245_v12, %v244_v10  ;;  %v247_v15 = vld [vmem:[#allocation9 + $0x28] sm:$0xff]  ;;  %v248_v17 = vld [vmem:[#allocation9 + $0x30] sm:$0xff]  ;;  %v249_v18 = vld [vmem:[#allocation9 + $0x38] sm:$0xff] }
  0x60   :  { %451 = vmatprep.subr.bf16.mxu0 %v450_v6  ;;  %v462_v16 = vpack.c.bf16 %v247_v15, %v246_v14  ;;  %v466_v19 = vpack.c.bf16 %v249_v18, %v248_v17  ;;  %v250_v20 = vld [vmem:[#allocation9 + $0x40] sm:$0xff]  ;;  %v251_v21 = vld [vmem:[#allocation9 + $0x48] sm:$0xff]  ;;  %v252_v23 = vld [vmem:[#allocation9 + $0x50] sm:$0xff]  ;;  %p619_p1 = por %p618_p0, %p617_p13 }
  0x61   :  { %455 = vmatprep.subr.bf16.mxu1 %v454_v11  ;;  %v470_v22 = vpack.c.bf16 %v251_v21, %v250_v20  ;;  %v253_v24 = vld [vmem:[#allocation9 + $0x58] sm:$0xff]  ;;  %v254_v26 = vld [vmem:[#allocation9 + $0x60] sm:$0xff]  ;;  %v255_v27 = vld [vmem:[#allocation9 + $0x68] sm:$0xff] }
  0x62   :  { %457 = vmatpush3.bf16.msra.mxu1 %v454_v11  ;;  %v474_v25 = vpack.c.bf16 %v253_v24, %v252_v23  ;;  %v478_v28 = vpack.c.bf16 %v255_v27, %v254_v26  ;;  %v256_v29 = vld [vmem:[#allocation9 + $0x70] sm:$0xff]  ;;  %v257_v30 = vld [vmem:[#allocation9 + $0x78] sm:$0xff]  ;;  %v375_v23 = vld [vmem:[#allocation11] ss:$0 sm:$0xff]  ;;  %p620_p2 = pnand %p619_p1, %p613_p12 }
  0x63   :  { %453 = vmatpush3.bf16.msra.mxu0 %v450_v6  ;;  %459 = vmatprep.subr.bf16.mxu1 %v458_v13  ;;  %v482_v31 = vpack.c.bf16 %v257_v30, %v256_v29  ;;  %v372_v32 = vld [vmem:[#allocation8] ss:$0 sm:$0xff] }
  0x66   :  { %409 = vmatmul.mubr.msk.f32.vlgmr.msra.gmra.mrb[0].mxu0 %vm104_vm0, %v92_v7  ;;  %461 = vmatpush3.bf16.msra.mxu1 %v458_v13 }
  0x67   :  { %463 = vmatprep.subr.bf16.mxu1 %v462_v16 }
  0x6a   :  { %465 = vmatpush3.bf16.msra.mxu1 %v462_v16 }
  0x6b   :  { %467 = vmatprep.subr.bf16.mxu1 %v466_v19 }
  0x6e   :  { %469 = vmatpush3.bf16.msra.mxu1 %v466_v19 }
  0x6f   :  { %471 = vmatprep.subr.bf16.mxu1 %v470_v22 }
  0x72   :  { %473 = vmatpush3.bf16.msra.mxu1 %v470_v22 }
  0x73   :  { %475 = vmatprep.subr.bf16.mxu1 %v474_v25 }
  0x76   :  { %477 = vmatpush3.bf16.msra.mxu1 %v474_v25 }
  0x77   :  { %479 = vmatprep.subr.bf16.mxu1 %v478_v28 }
  0x7a   :  { %481 = vmatpush3.bf16.msra.mxu1 %v478_v28 }
  0x7b   :  { %483 = vmatprep.subr.bf16.mxu1 %v482_v31 }
  0x7e   :  { %485 = vmatpush3.bf16.msra.mxu1 %v482_v31 }
 0x139   :  { %v410_v33 = vpop.f32.mrb[0].mxu0 }
 0x13a   :  { %v183_v34 = vadd.f32 %v410_v33, %v372_v32  ;;  %v177_v35 = vpop.f32.mrb[1].mxu0 }
 0x13b   :  { %v178_v36 = vadd.f32 %v372_v32, %v177_v35 }
 0x13c   :  { %v189_v37 = vmul.f32 0.70710677, %v183_v34  ;;  %v187_v20 = vmul.f32 0.5, %v183_v34 }
 0x13d   :  { %v188_v38 = vmul.f32 0.70710677, %v178_v36  ;;  %v186_v18 = vmul.f32 0.5, %v178_v36 }
 0x13e   :  { %v191_v39 = vand.u32 2147483647, %v189_v37  ;;  %vm231_vm1 = vcmp.lt.f32.partialorder %v189_v37, 0.0 }
 0x13f   :  { %v190_v40 = vand.u32 2147483647, %v188_v38  ;;  %vm230_vm2 = vcmp.lt.f32.partialorder %v188_v38, 0.0 }
 0x140   :  { %v193_v41 = vmul.f32 0.3275911, %v191_v39  ;;  %v219_v45 = vsub.f32 0.0, %v191_v39 }
 0x141   :  { %v192_v42 = vmul.f32 0.3275911, %v190_v40  ;;  %v218_v46 = vsub.f32 0.0, %v190_v40 }
 0x142   :  { %v195_v43 = vadd.f32 1.0, %v193_v41  ;;  %v221_v48 = vmul.f32 %v219_v45, %v191_v39 }
 0x143   :  { %v194_v44 = vadd.f32 1.0, %v192_v42  ;;  %v220_v50 = vmul.f32 %v218_v46, %v190_v40 }
 0x144   :  { %494 = vrcp.f32 %v195_v43  ;;  %v224_v54 = vmul.f32 1.442695, %v221_v48 }
 0x145   :  { %496 = vrcp.f32 %v194_v44  ;;  %v222_v56 = vmul.f32 1.442695, %v220_v50 }
 0x146   :  { %498 = vpow2.f32 %v224_v54 }
 0x147   :  { %500 = vpow2.f32 %v222_v56 }
 0x14e   :  { %v495_v47 = vpop.eup %494 }
 0x14f   :  { %v497_v49 = vpop.eup %496  ;;  %v201_v51 = vmul.f32 1.0614054, %v495_v47 }
 0x150   :  { %v200_v52 = vmul.f32 1.0614054, %v497_v49  ;;  %v499_v6 = vpop.eup %498 }
 0x151   :  { %v203_v53 = vadd.f32 -1.4531521, %v201_v51  ;;  %v501_v8 = vpop.eup %500 }
 0x152   :  { %v202_v55 = vadd.f32 -1.4531521, %v200_v52 }
 0x153   :  { %v205_v57 = vmul.f32 %v495_v47, %v203_v53 }
 0x154   :  { %v204_v58 = vmul.f32 %v497_v49, %v202_v55 }
 0x155   :  { %v207_v59 = vadd.f32 1.4214138, %v205_v57 }
 0x156   :  { %v206_v60 = vadd.f32 1.4214138, %v204_v58 }
 0x157   :  { %v209_v61 = vmul.f32 %v495_v47, %v207_v59 }
 0x158   :  { %v208_v62 = vmul.f32 %v497_v49, %v206_v60 }
 0x159   :  { %v211_v63 = vadd.f32 -0.28449672, %v209_v61 }
 0x15a   :  { %v210_v0 = vadd.f32 -0.28449672, %v208_v62 }
 0x15b   :  { %v213_v1 = vmul.f32 %v495_v47, %v211_v63 }
 0x15c   :  { %v212_v2 = vmul.f32 %v497_v49, %v210_v0 }
 0x15d   :  { %v215_v3 = vadd.f32 0.2548296, %v213_v1 }
 0x15e   :  { %v214_v4 = vadd.f32 0.2548296, %v212_v2 }
 0x15f   :  { %v217_v5 = vmul.f32 %v495_v47, %v215_v3 }
 0x160   :  { %v216_v7 = vmul.f32 %v497_v49, %v214_v4 }
 0x161   :  { %v227_v9 = vmul.f32 %v499_v6, %v217_v5 }
 0x162   :  { %v226_v10 = vmul.f32 %v501_v8, %v216_v7 }
 0x163   :  { %v229_v11 = vsub.f32 1.0, %v227_v9 }
 0x164   :  { %v228_v12 = vsub.f32 1.0, %v226_v10 }
 0x165   :  { %v233_v13 = vsub.f32 0.0, %v229_v11 }
 0x166   :  { %v232_v14 = vsub.f32 0.0, %v228_v12 }
 0x167   :  { %v235_v15 = vsel %vm231_vm1, %v233_v13, %v229_v11 }
 0x168   :  { %v234_v16 = vsel %vm230_vm2, %v232_v14, %v228_v12  ;;  %v237_v17 = vadd.f32 1.0, %v235_v15 }
 0x169   :  { %v236_v19 = vadd.f32 1.0, %v234_v16 }
 0x16a   :  { %v239_v22 = vmul.f32 %v237_v17, %v187_v20 }
 0x16b   :  { %v238_v21 = vmul.f32 %v236_v19, %v186_v18 }
 0x16d   :  { %443 = vmatprep.mubr.f32.mxu1 %v238_v21 }
 0x16e   :  { %444 = vmatmul.mubr.f32.vlgmr.msra.gmra.mrb[0].mxu1 %v239_v22 }
 0x241   :  { %v445_v24 = vpop.f32.mrb[0].mxu1 }
 0x242   :  { %v350_v25 = vadd.f32 %v445_v24, %v375_v23  ;;  %v324_v26 = vpop.f32.mrb[1].mxu1 }
 0x243   :  { %v349_v27 = vadd.f32 %v375_v23, %v324_v26 }
 0x244   :  { %352 = vst [vmem:[#allocation12 + $0x8] sm:$0xff] %v350_v25 }
 0x245   :  { %351 = vst [vmem:[#allocation12] sm:$0xff] %v349_v27 }
 0x246   :  { %623 = shalt.err (!%p620_p2)
}
 0x247   :  { %s624_s9 = scalar_lea.hbm %s776_s5, 256 }
 0x248   :  { %p625_p3 = scmp.ne.s32.totalorder %s776_s5, %s624_s9  ;;  %p628_p4 = scmp.lt.u32.totalorder %s624_s9, %s776_s5 }
 0x24a   :  { %p630_p5 = pnand %p628_p4, %p625_p3 }
 0x24c   :  { %633 = shalt.err (!%p630_p5)
}
 0x24d   :  { %364 = dma.vmem_to_hbm [thread:$0]  %s359_s3, 256, %s776_s5, [#allocation5], %s644_s30, %s644_s30, %s645_s6  }
 0x24e   :  { %640 = dma.done.wait [#allocation5], 256  }
 0x24f   :  { %641 = vsyncadd [#allocation5], 4294967040 }
 0x250   :  { %368 = vsyncpa [#allocation4], 1 }
 0x251   :  { %369 = vsyncpa [#allocation7], 1 }
 0x252   :  { %370 = vsyncpa [#allocation10], 1 }
 0x253   :  { %371 = vsyncpa [#allocation5], 1 }

</bundles_post_ra>
